<compile_context>
chip_gen: v6e
topology: v6e:2x2x1
jax: 0.10.0
libtpu: 0.0.40
codegen_flags: <defaults>
</compile_context>

<pallas_src>
import functools

import jax
import jax.numpy as jnp
from jax.experimental import pallas as pl
from jax.experimental.pallas import tpu as pltpu


def _round_up(x, m):
    return ((x + m - 1) // m) * m


def _mlp_fused_kernel(x_ref, *refs, n_layers, last_act):
    """Fused MLP: refs = (w0, b0, w1, b1, ..., w_{L-1}, b_{L-1}, o_ref).

    x_ref: (TM, K0) activation tile
    w_i:   (K_i, N_i) full weight (pre-transposed)
    b_i:   (1, N_i)  bias
    o_ref: (TM, N_last) output tile
    Intermediates are chained as values (kept in vregs/VMEM), never written to HBM.
    """
    o_ref = refs[-1]
    h = x_ref[...].astype(jnp.float32)
    for i in range(n_layers):
        w_ref = refs[2 * i]
        b_ref = refs[2 * i + 1]
        h = jnp.dot(h, w_ref[...], preferred_element_type=jnp.float32)
        h = h + b_ref[...]  # broadcast (1, N_i) over rows
        if (i < n_layers - 1) or last_act:
            h = jnp.maximum(h, 0.0)  # ReLU
    o_ref[...] = h.astype(o_ref.dtype)


def mlp_forward(x, params, last_act=False, tm=256):
    """Full MLP forward in ONE pallas_call.

    x:      (M, K0) activations
    params: list of (w_t, b) with w_t: (K_i, N_i), b: (1, N_i)
    """
    M, K0 = x.shape
    n_layers = len(params)
    N_out = params[-1][0].shape[1]

    # Batch tile: multiple of 8 sublanes, capped so VMEM stays tiny on every
    # generation (x tile + out tile + all weights, x2 for double buffering,
    # is well under 1 MiB here).
    tm_eff = min(_round_up(M, 8), _round_up(tm, 8))
    grid = (pl.cdiv(M, tm_eff),)

    # Activation tile marches over the batch; weights/biases are full blocks
    # that stay resident (index_map constant across the grid).
    in_specs = [pl.BlockSpec((tm_eff, K0), lambda i: (i, 0))]
    flat_args = [x]
    for (w_t, b) in params:
        k, n = w_t.shape
        in_specs.append(pl.BlockSpec((k, n), lambda i: (0, 0)))
        in_specs.append(pl.BlockSpec((1, n), lambda i: (0, 0)))
        flat_args.append(w_t)
        flat_args.append(b)
    out_specs = pl.BlockSpec((tm_eff, N_out), lambda i: (i, 0))

    # Advisory cost estimate for the XLA scheduler.
    flops = 0
    bytes_accessed = x.size * x.dtype.itemsize + M * N_out * x.dtype.itemsize
    for (w_t, b) in params:
        k, n = w_t.shape
        flops += 2 * M * k * n
        bytes_accessed += w_t.size * w_t.dtype.itemsize + b.size * b.dtype.itemsize

    kernel = functools.partial(_mlp_fused_kernel, n_layers=n_layers, last_act=last_act)

    return pl.pallas_call(
        kernel,
        out_shape=jax.ShapeDtypeStruct((M, N_out), x.dtype),
        grid=grid,
        in_specs=in_specs,
        out_specs=out_specs,
        compiler_params=pltpu.CompilerParams(
            dimension_semantics=("parallel",),  # batch tiles are independent
        ),
        cost_estimate=pl.CostEstimate(
            flops=flops, transcendentals=0, bytes_accessed=bytes_accessed
        ),
    )(*flat_args)


def init_mlp_params(key, dim_in_hid_out):
    """Deterministic parameter init matching XavierLinear:
      - weight: xavier_normal_  (std = sqrt(2 / (fan_in + fan_out)))
      - bias:   torch.nn.Linear default, U(-1/sqrt(fan_in), 1/sqrt(fan_in))
    Weights are stored pre-transposed as (in, out).
    """
    params = []
    for i in range(len(dim_in_hid_out) - 1):
        fan_in, fan_out = dim_in_hid_out[i], dim_in_hid_out[i + 1]
        key, kw, kb = jax.random.split(key, 3)
        std = (2.0 / (fan_in + fan_out)) ** 0.5
        w_t = std * jax.random.normal(kw, (fan_in, fan_out), dtype=jnp.float32)
        bound = 1.0 / (fan_in ** 0.5)
        b = jax.random.uniform(
            kb, (1, fan_out), dtype=jnp.float32, minval=-bound, maxval=bound
        )
        params.append((w_t, b))
    return params


def mlp_forward_ref(x, params, last_act=False):
    """Pure-JAX reference for correctness checking."""
    n_layers = len(params)
    out = x
    for i, (w_t, b) in enumerate(params):
        out = out @ w_t + b
        if (i < n_layers - 1) or last_act:
            out = jnp.maximum(out, 0.0)
    return out


if __name__ == "__main__":
    # Small MLP: dim_in_hid_out = [32, 64, 48, 16], act_fn='ReLU', last_act=False
    dim_in_hid_out = [32, 64, 48, 16]
    batch = 8

    key = jax.random.PRNGKey(0)
    key, kx = jax.random.split(key)
    x = jax.random.normal(kx, (batch, dim_in_hid_out[0]), dtype=jnp.float32)

    params = init_mlp_params(key, dim_in_hid_out)

    # 1) Small-shape run (single grid step, matches the module's typical use).
    out = mlp_forward(x, params, last_act=False)
    out = jax.block_until_ready(out)
    ref = mlp_forward_ref(x, params, last_act=False)
    assert out.shape == (batch, dim_in_hid_out[-1]), out.shape
    assert jnp.allclose(out, ref, atol=1e-5, rtol=1e-5), "mismatch vs JAX reference"

    # 2) Larger batch to exercise the tiled / parallel grid path (grid=(4,)).
    key, kx2 = jax.random.split(key)
    x_big = jax.random.normal(kx2, (1024, dim_in_hid_out[0]), dtype=jnp.float32)
    out_big = jax.block_until_ready(mlp_forward(x_big, params, last_act=False, tm=256))
    ref_big = mlp_forward_ref(x_big, params, last_act=False)
    assert out_big.shape == (1024, dim_in_hid_out[-1]), out_big.shape
    assert jnp.allclose(out_big, ref_big, atol=1e-5, rtol=1e-5), "mismatch (tiled path)"

    print("KERNEL_OK")
</pallas_src>

<mosaic_0001>
module attributes {stable_mosaic.version = 11 : i64} {
  func.func @_mlp_fused_kernel(%arg0: i32, %arg1: memref<8x32xf32, #tpu.memory_space<vmem>>, %arg2: memref<32x64xf32, #tpu.memory_space<vmem>>, %arg3: memref<1x64xf32, #tpu.memory_space<vmem>>, %arg4: memref<64x48xf32, #tpu.memory_space<vmem>>, %arg5: memref<1x48xf32, #tpu.memory_space<vmem>>, %arg6: memref<48x16xf32, #tpu.memory_space<vmem>>, %arg7: memref<1x16xf32, #tpu.memory_space<vmem>>, %arg8: memref<8x16xf32, #tpu.memory_space<vmem>>) attributes {dimension_semantics = [#tpu.dimension_semantics<parallel>], iteration_bounds = array<i64: 1>, scalar_prefetch = 0 : i64, scratch_operands = 0 : i64, tpu.core_type = #tpu.core_type<tc>, window_params = [{transform_indices = @transform_0, window_bounds = array<i64: 8, 32>}, {pipeline_mode = #tpu.pipeline_mode<synchronous>, transform_indices = @transform_1, window_bounds = array<i64: 32, 64>}, {pipeline_mode = #tpu.pipeline_mode<synchronous>, transform_indices = @transform_2, window_bounds = array<i64: 1, 64>}, {pipeline_mode = #tpu.pipeline_mode<synchronous>, transform_indices = @transform_3, window_bounds = array<i64: 64, 48>}, {pipeline_mode = #tpu.pipeline_mode<synchronous>, transform_indices = @transform_4, window_bounds = array<i64: 1, 48>}, {pipeline_mode = #tpu.pipeline_mode<synchronous>, transform_indices = @transform_5, window_bounds = array<i64: 48, 16>}, {pipeline_mode = #tpu.pipeline_mode<synchronous>, transform_indices = @transform_6, window_bounds = array<i64: 1, 16>}, {transform_indices = @transform_7, window_bounds = array<i64: 8, 16>}]} {
    %c0 = arith.constant 0 : index
    %c0_0 = arith.constant 0 : index
    %0 = vector.load %arg1[%c0, %c0_0] : memref<8x32xf32, #tpu.memory_space<vmem>>, vector<8x32xf32>
    %c0_1 = arith.constant 0 : index
    %c0_2 = arith.constant 0 : index
    %1 = vector.load %arg2[%c0_1, %c0_2] : memref<32x64xf32, #tpu.memory_space<vmem>>, vector<32x64xf32>
    %cst = arith.constant dense<0.000000e+00> : vector<8x64xf32>
    %2 = tpu.matmul %0, %1, %cst {dimension_numbers = #tpu.dot_dimension_numbers<[1], [0], [0], [1], [0, 0, 1, 1], [], []>} : vector<8x32xf32>, vector<32x64xf32>, vector<8x64xf32> -> vector<8x64xf32>
    %c0_3 = arith.constant 0 : index
    %c0_4 = arith.constant 0 : index
    %3 = vector.load %arg3[%c0_3, %c0_4] : memref<1x64xf32, #tpu.memory_space<vmem>>, vector<1x64xf32>
    %4 = vector.broadcast %3 : vector<1x64xf32> to vector<8x64xf32>
    %5 = arith.addf %2, %4 : vector<8x64xf32>
    %cst_5 = arith.constant 0.000000e+00 : f32
    %6 = vector.broadcast %cst_5 : f32 to vector<8x64xf32>
    %7 = arith.maximumf %5, %6 : vector<8x64xf32>
    %c0_6 = arith.constant 0 : index
    %c0_7 = arith.constant 0 : index
    %8 = vector.load %arg4[%c0_6, %c0_7] : memref<64x48xf32, #tpu.memory_space<vmem>>, vector<64x48xf32>
    %cst_8 = arith.constant dense<0.000000e+00> : vector<8x48xf32>
    %9 = tpu.matmul %7, %8, %cst_8 {dimension_numbers = #tpu.dot_dimension_numbers<[1], [0], [0], [1], [0, 0, 1, 1], [], []>} : vector<8x64xf32>, vector<64x48xf32>, vector<8x48xf32> -> vector<8x48xf32>
    %c0_9 = arith.constant 0 : index
    %c0_10 = arith.constant 0 : index
    %10 = vector.load %arg5[%c0_9, %c0_10] : memref<1x48xf32, #tpu.memory_space<vmem>>, vector<1x48xf32>
    %11 = vector.broadcast %10 : vector<1x48xf32> to vector<8x48xf32>
    %12 = arith.addf %9, %11 : vector<8x48xf32>
    %cst_11 = arith.constant 0.000000e+00 : f32
    %13 = vector.broadcast %cst_11 : f32 to vector<8x48xf32>
    %14 = arith.maximumf %12, %13 : vector<8x48xf32>
    %c0_12 = arith.constant 0 : index
    %c0_13 = arith.constant 0 : index
    %15 = vector.load %arg6[%c0_12, %c0_13] : memref<48x16xf32, #tpu.memory_space<vmem>>, vector<48x16xf32>
    %cst_14 = arith.constant dense<0.000000e+00> : vector<8x16xf32>
    %16 = tpu.matmul %14, %15, %cst_14 {dimension_numbers = #tpu.dot_dimension_numbers<[1], [0], [0], [1], [0, 0, 1, 1], [], []>} : vector<8x48xf32>, vector<48x16xf32>, vector<8x16xf32> -> vector<8x16xf32>
    %c0_15 = arith.constant 0 : index
    %c0_16 = arith.constant 0 : index
    %17 = vector.load %arg7[%c0_15, %c0_16] : memref<1x16xf32, #tpu.memory_space<vmem>>, vector<1x16xf32>
    %18 = vector.broadcast %17 : vector<1x16xf32> to vector<8x16xf32>
    %19 = arith.addf %16, %18 : vector<8x16xf32>
    %c0_17 = arith.constant 0 : index
    %c0_18 = arith.constant 0 : index
    %20 = vector.load %arg8[%c0_17, %c0_18] : memref<8x16xf32, #tpu.memory_space<vmem>>, vector<8x16xf32>
    tpu.vector_store %arg8[%c0_17, %c0_18], %19 {strides = array<i32>} : memref<8x16xf32, #tpu.memory_space<vmem>>, vector<8x16xf32>,
    return
  }
  func.func @transform_0(%arg0: i32) -> (i32, i32) {
    %c0_i32 = arith.constant 0 : i32
    %c0_i32_0 = arith.constant 0 : i32
    return %arg0, %c0_i32 : i32, i32
  }
  func.func @transform_1(%arg0: i32) -> (i32, i32) {
    %c0_i32 = arith.constant 0 : i32
    %c0_i32_0 = arith.constant 0 : i32
    %c0_i32_1 = arith.constant 0 : i32
    return %c0_i32, %c0_i32_0 : i32, i32
  }
  func.func @transform_2(%arg0: i32) -> (i32, i32) {
    %c0_i32 = arith.constant 0 : i32
    %c0_i32_0 = arith.constant 0 : i32
    %c0_i32_1 = arith.constant 0 : i32
    return %c0_i32, %c0_i32_0 : i32, i32
  }
  func.func @transform_3(%arg0: i32) -> (i32, i32) {
    %c0_i32 = arith.constant 0 : i32
    %c0_i32_0 = arith.constant 0 : i32
    %c0_i32_1 = arith.constant 0 : i32
    return %c0_i32, %c0_i32_0 : i32, i32
  }
  func.func @transform_4(%arg0: i32) -> (i32, i32) {
    %c0_i32 = arith.constant 0 : i32
    %c0_i32_0 = arith.constant 0 : i32
    %c0_i32_1 = arith.constant 0 : i32
    return %c0_i32, %c0_i32_0 : i32, i32
  }
  func.func @transform_5(%arg0: i32) -> (i32, i32) {
    %c0_i32 = arith.constant 0 : i32
    %c0_i32_0 = arith.constant 0 : i32
    %c0_i32_1 = arith.constant 0 : i32
    return %c0_i32, %c0_i32_0 : i32, i32
  }
  func.func @transform_6(%arg0: i32) -> (i32, i32) {
    %c0_i32 = arith.constant 0 : i32
    %c0_i32_0 = arith.constant 0 : i32
    %c0_i32_1 = arith.constant 0 : i32
    return %c0_i32, %c0_i32_0 : i32, i32
  }
  func.func @transform_7(%arg0: i32) -> (i32, i32) {
    %c0_i32 = arith.constant 0 : i32
    %c0_i32_0 = arith.constant 0 : i32
    return %arg0, %c0_i32 : i32, i32
  }
}

</mosaic_0001>

<bundles_post_ra>
// kernel: tpu_custom_call.1
= control target key start
LH: loop header
LB: loop body
LE: loop exit
PB: predicated region body
PF: predicated region fallthrough
CT: control target
= control target key end

     0   :  { %v404_v1 = vmov 0.0   ;;  %vm405_vm0 = vmmov 0   ;;  %s540_s0 = inlined_call_operand.vmem [shape: f32[8,32], index: 0, kind: input, shape index: {}]   ;;  %s541_s1 = inlined_call_operand.vmem [shape: f32[32,64], index: 1, kind: input, shape index: {}]   ;;  %s542_s2 = inlined_call_operand.vmem [shape: f32[1,64], index: 2, kind: input, shape index: {}]   ;;  %s543_s3 = inlined_call_operand.vmem [shape: f32[64,48], index: 3, kind: input, shape index: {}]   ;;  %s544_s4 = inlined_call_operand.vmem [shape: f32[1,48], index: 4, kind: input, shape index: {}]   ;;  %s545_s5 = inlined_call_operand.vmem [shape: f32[48,16], index: 5, kind: input, shape index: {}]   ;;  %s546_s6 = inlined_call_operand.vmem [shape: f32[1,16], index: 6, kind: input, shape index: {}]   ;;  %s547_s7 = inlined_call_operand.hbm [shape: f32[8,16], index: 7, kind: output, shape index: {}]  }
   0x1   :  { %v31_v0 = vld [vmem:[%s541_s1 + $0x18] sm:$0xff]  ;;  %334 = vmatprep.subr.mxu0 %v404_v1  ;;  %v30_v2 = vld [vmem:[%s541_s1 + $0x10] sm:$0xff]  ;;  %342 = vmatprep.mubr.msk.f32.mxu0 %vm405_vm0, %v404_v1  ;;  %v29_v5 = vld [vmem:[%s541_s1 + $0x8] sm:$0xff] }
   0x2   :  { %v121_v3 = vld [vmem:[%s543_s3 + $0x38] sm:$0xff]  ;;  %335 = vmatpush3.msra.mxu0 %v31_v0  ;;  %345 = vmatprep.subr.mxu1 %v404_v1  ;;  %v120_v4 = vld [vmem:[%s543_s3 + $0x30] sm:$0xff] }
   0x3   :  { %336 = vmatprep.subr.mxu0 %v404_v1  ;;  %346 = vmatpush3.msra.mxu1 %v121_v3 }
   0x4   :  { %12 = vsyncpa [#allocation3], 0  ;;  %337 = vmatpush3.msra.mxu0 %v30_v2  ;;  %347 = vmatprep.subr.mxu1 %v404_v1  ;;  %v119_v6 = vld [vmem:[%s543_s3 + $0x28] sm:$0xff]  ;;  %v28_v7 = vld [vmem:[%s541_s1] sm:$0xff]  ;;  %vm39_vm1 = vcmask 261120   ;;  %vm129_vm2 = vcmask 523264  }
   0x5   :  { %338 = vmatprep.subr.mxu0 %v404_v1  ;;  %348 = vmatpush3.msra.mxu1 %v120_v4  ;;  %v27_v8 = vld [vmem:[%s540_s0] sm:$0xff]  ;;  %v117_v10 = vld [vmem:[%s543_s3 + $0x18] sm:$0xff]  ;;  %v116_v11 = vld [vmem:[%s543_s3 + $0x10] sm:$0xff]  ;;  %vm217_vm3 = vcmask 392192   ;;  %s406_s18 = smov [#allocation2]   ;;  %vm291_vm4 = vcmask 130048  }
   0x6   :  { %339 = vmatpush3.msra.mxu0 %v29_v5  ;;  %349 = vmatprep.subr.mxu1 %v404_v1  ;;  %v118_v9 = vld [vmem:[%s543_s3 + $0x20] sm:$0xff]  ;;  %v115_v12 = vld [vmem:[%s543_s3 + $0x8] sm:$0xff]  ;;  %v207_v16 = vld [vmem:[%s545_s5 + $0x18] sm:$0xff]  ;;  %s299_s1 = sshll.u32 %s406_s18, 4  ;;  %s300_s1 = int_to_ptr.vmem [resolvable:$true] %s299_s1 }
   0x7   :  { %340 = vmatprep.subr.mxu0 %v404_v1  ;;  %350 = vmatpush3.msra.mxu1 %v119_v6  ;;  %v114_v13 = vld [vmem:[%s543_s3] sm:$0xff]  ;;  %v209_v14 = vld [vmem:[%s545_s5 + $0x28] sm:$0xff]  ;;  %v206_v22 = vld [vmem:[%s545_s5 + $0x10] sm:$0xff]  ;;  %p387_p1 = scmp.lt.s32.totalorder %s300_s1, %s300_s1 }
   0x8   :  { %341 = vmatpush3.msra.mxu0 %v28_v7  ;;  %351 = vmatprep.subr.mxu1 %v404_v1  ;;  %v208_v15 = vld [vmem:[%s545_s5 + $0x20] sm:$0xff]  ;;  %v205_v23 = vld [vmem:[%s545_s5 + $0x8] sm:$0xff] }
   0x9   :  { %343 = vmatmul.mubr.msk.f32.vlgmr.msra.gmra.mxu0 %vm39_vm1, %v27_v8  ;;  %352 = vmatpush3.msra.mxu1 %v118_v9  ;;  %v307_v17 = vld [vmem:[%s542_s2] ss:$0 sm:$0xff] }
   0xa   :  { %353 = vmatprep.subr.mxu1 %v404_v1  ;;  %361 = vmatprep.mubr.msk.f32.mxu1 %vm405_vm0, %v404_v1  ;;  %v204_v24 = vld [vmem:[%s545_s5] sm:$0xff]  ;;  %s382_s5 = scalar_lea.vmem %s300_s1, 128 }
   0xb   :  { %354 = vmatpush3.msra.mxu1 %v117_v10  ;;  %364 = vmatprep.subr.mxu0 %v404_v1  ;;  %v309_v25 = vld [vmem:[%s544_s4] ss:$0 sm:$0xff]  ;;  %p383_p0 = scmp.ne.s32.totalorder %s300_s1, %s382_s5  ;;  %p388_p2 = scmp.lt.s32.totalorder %s382_s5, %s382_s5 }
   0xc   :  { %355 = vmatprep.subr.mxu1 %v404_v1  ;;  %376 = vmatprep.mubr.msk.f32.mxu0 %vm405_vm0, %v404_v1  ;;  %v311_v30 = vld [vmem:[%s546_s6] ss:$0 sm:$0xff] }
   0xd   :  { %356 = vmatpush3.msra.mxu1 %v116_v11  ;;  %365 = vmatpush3.msra.mxu0 %v209_v14  ;;  %p389_p3 = por %p388_p2, %p387_p1 }
   0xe   :  { %357 = vmatprep.subr.mxu1 %v404_v1  ;;  %366 = vmatprep.subr.mxu0 %v404_v1 }
   0xf   :  { %358 = vmatpush3.msra.mxu1 %v115_v12  ;;  %367 = vmatpush3.msra.mxu0 %v208_v15  ;;  %p390_p4 = pnand %p389_p3, %p383_p0 }
  0x10   :  { %359 = vmatprep.subr.mxu1 %v404_v1  ;;  %368 = vmatprep.subr.mxu0 %v404_v1 }
  0x11   :  { %360 = vmatpush3.msra.mxu1 %v114_v13  ;;  %369 = vmatpush3.msra.mxu0 %v207_v16 }
  0x12   :  { %370 = vmatprep.subr.mxu0 %v404_v1 }
  0x13   :  { %371 = vmatpush3.msra.mxu0 %v206_v22 }
  0x14   :  { %372 = vmatprep.subr.mxu0 %v404_v1 }
  0x15   :  { %373 = vmatpush3.msra.mxu0 %v205_v23 }
  0x16   :  { %374 = vmatprep.subr.mxu0 %v404_v1 }
  0x17   :  { %375 = vmatpush3.msra.mxu0 %v204_v24 }
  0xc9   :  { %v109_v18 = vpop.f32.mrf.mxu0 }
  0xca   :  { %v110_v19 = vadd.f32 %v307_v17, %v109_v18 }
  0xcb   :  { %v344_v20 = vpop.f32.mrf.mxu0 }
  0xcc   :  { %v113_v21 = vmax.f32 %v110_v19, 0.0 }
  0xce   :  { %362 = vmatmul.mubr.msk.f32.vlgmr.msra.gmra.mxu1 %vm129_vm2, %v113_v21 }
 0x18e   :  { %v199_v26 = vpop.f32.mrf.mxu1 }
 0x18f   :  { %v200_v27 = vadd.f32 %v309_v25, %v199_v26 }
 0x190   :  { %v363_v28 = vpop.f32.mrf.mxu1 }
 0x191   :  { %v203_v29 = vmax.f32 %v200_v27, 0.0 }
 0x193   :  { %377 = vmatmul.mubr.msk.f32.vlgmr.msra.gmra.mxu0 %vm217_vm3, %v203_v29 }
 0x253   :  { %v287_v31 = vpop.f32.mrf.mxu0 }
 0x254   :  { %v288_v32 = vadd.f32 %v311_v30, %v287_v31 }
 0x255   :  { %v378_v33 = vpop.f32.mrf.mxu0 }
 0x256   :  { %292 = vst.msk [vmem:[#allocation2] sm:$0xff] %vm291_vm4, %v288_v32 }
 0x257   :  { %393 = shalt.err (!%p390_p4)
}
 0x258   :  { %302 = dma.vmem_to_hbm [thread:$0]  %s300_s1, 128, %s547_s7, [#allocation3]  }
 0x259   :  { %402 = dma.done.wait [#allocation3], 128  }
 0x25a   :  { %403 = vsyncadd [#allocation3], 4294967168 }
 0x25b   :  { %306 = vsyncpa [#allocation3], 1 }

</bundles_post_ra>
